<compile_context>
chip_gen: v6e
topology: v6e:2x2x1
jax: 0.10.0
libtpu: 0.0.40
codegen_flags: <defaults>
</compile_context>

<pallas_src>
import functools

import jax
import jax.numpy as jnp
from jax import lax
from jax.experimental import pallas as pl
from jax.experimental.pallas import tpu as pltpu


def _conv_kernel(x_ref, w_ref, o_ref, *, W_s, out_len):
    # x_ref: (Cin, L)        zero-padded image, flattened row-major with row
    #                        stride W_s; L >= out_len + 2*W_s + 2 (zero tail),
    #                        so every tap slice reads real zeroed data.
    # w_ref: (9, Cout, Cin)  per-tap weights, tap index k = 3*i + j
    # o_ref: (Cout, out_len) out^T; valid pixels at t = W_s*r + c with c < W.
    acc = jnp.zeros(o_ref.shape, jnp.float32)
    for k in range(9):
        i, j = k // 3, k % 3
        off = W_s * i + j
        xs = x_ref[:, off:off + out_len]          # (Cin, out_len) static lane slice
        acc = acc + jnp.dot(w_ref[k], xs, preferred_element_type=jnp.float32)
    o_ref[...] = acc


def prepare_weights(w_oihw):
    """OIHW (Cout, Cin, 3, 3) -> (9, Cout, Cin).  Run ONCE at load time."""
    Cout, Cin, KH, KW = w_oihw.shape
    assert KH == 3 and KW == 3
    return jnp.transpose(w_oihw, (2, 3, 0, 1)).reshape(KH * KW, Cout, Cin)


@jax.jit
def conv2d_3x3_same(x_nchw, w_taps):
    """Conv2d(stride=1, padding=1, bias=False); w_taps from prepare_weights."""
    N, Cin, H, W = x_nchw.shape
    KK, Cout, Cin_w = w_taps.shape
    assert N == 1 and Cin == Cin_w and KK == 9

    W_s = W + 2                 # padded row stride
    out_len = H * W_s           # output lane count (epilogue is then a pure reshape)

    # Prologue (one tiny, fuseable XLA copy): CHW spatial zero-pad + flatten.
    # One extra zero row at the bottom keeps the largest tap read
    # (out_len - 1 + 2*W_s + 2) inside real, zero-filled data.
    x_pad = jnp.pad(x_nchw.reshape(Cin, H, W), ((0, 0), (1, 2), (1, 1)))
    x_flat = x_pad.reshape(Cin, (H + 3) * W_s)

    flops = 2 * Cout * (9 * Cin) * out_len
    bytes_accessed = (x_flat.size + w_taps.size + Cout * out_len) * 4

    out_t = pl.pallas_call(
        functools.partial(_conv_kernel, W_s=W_s, out_len=out_len),
        out_shape=jax.ShapeDtypeStruct((Cout, out_len), jnp.float32),
        in_specs=[
            pl.BlockSpec(memory_space=pltpu.MemorySpace.VMEM),
            pl.BlockSpec(memory_space=pltpu.MemorySpace.VMEM),
        ],
        out_specs=pl.BlockSpec(memory_space=pltpu.MemorySpace.VMEM),
        cost_estimate=pl.CostEstimate(
            flops=flops, transcendentals=0, bytes_accessed=bytes_accessed),
    )(x_flat, w_taps)

    # Epilogue: output is already channel-major -> reshape + drop the padded
    # columns of the W_s-stride grid; no transpose needed.
    return out_t.reshape(Cout, H, W_s)[:, :, :W][None]


if __name__ == "__main__":
    key = jax.random.PRNGKey(0)
    kx, kw = jax.random.split(key)

    # Shapes from the module: x641 ~ [1, 128, 7, 7], weight ~ [32, 128, 3, 3]
    x = jax.random.normal(kx, (1, 128, 7, 7), dtype=jnp.float32)
    w = jax.random.normal(kw, (32, 128, 3, 3), dtype=jnp.float32) * 0.05

    # One-time weight re-layout, hoisted out of the forward path.
    w_taps = jax.block_until_ready(prepare_weights(w))

    y = conv2d_3x3_same(x, w_taps)
    y = jax.block_until_ready(y)

    # Reference: XLA convolution (same semantics as torch Conv2d, bias=False).
    y_ref = lax.conv_general_dilated(
        x, w, window_strides=(1, 1), padding=((1, 1), (1, 1)),
        dimension_numbers=("NCHW", "OIHW", "NCHW"))
    y_ref = jax.block_until_ready(y_ref)

    assert y.shape == (1, 32, 7, 7), y.shape
    assert jnp.allclose(y, y_ref, atol=1e-3, rtol=1e-3), "mismatch vs reference"

    print("KERNEL_OK")
</pallas_src>

<mosaic_0001>
module attributes {stable_mosaic.version = 11 : i64} {
  func.func @_conv_kernel(%arg0: memref<128x90xf32, #tpu.memory_space<vmem>>, %arg1: memref<9x32x128xf32, #tpu.memory_space<vmem>>, %arg2: memref<32x63xf32, #tpu.memory_space<vmem>>) attributes {dimension_semantics = [], scalar_prefetch = 0 : i64, scratch_operands = 0 : i64, tpu.core_type = #tpu.core_type<tc>} {
    %cst = arith.constant 0.000000e+00 : f32
    %0 = vector.broadcast %cst : f32 to vector<32x63xf32>
    %c0 = arith.constant 0 : index
    %c0_0 = arith.constant 0 : index
    %1 = vector.load %arg0[%c0, %c0_0] : memref<128x90xf32, #tpu.memory_space<vmem>>, vector<128x63xf32>
    %c0_1 = arith.constant 0 : index
    %c0_2 = arith.constant 0 : index
    %c0_3 = arith.constant 0 : index
    %2 = vector.load %arg1[%c0_1, %c0_2, %c0_3] : memref<9x32x128xf32, #tpu.memory_space<vmem>>, vector<1x32x128xf32>
    %3 = vector.shape_cast %2 : vector<1x32x128xf32> to vector<32x128xf32>
    %cst_4 = arith.constant dense<0.000000e+00> : vector<32x63xf32>
    %4 = tpu.matmul %3, %1, %cst_4 {dimension_numbers = #tpu.dot_dimension_numbers<[1], [0], [0], [1], [0, 0, 1, 1], [], []>} : vector<32x128xf32>, vector<128x63xf32>, vector<32x63xf32> -> vector<32x63xf32>
    %5 = arith.addf %0, %4 : vector<32x63xf32>
    %c0_5 = arith.constant 0 : index
    %c1 = arith.constant 1 : index
    %6 = vector.load %arg0[%c0_5, %c1] : memref<128x90xf32, #tpu.memory_space<vmem>>, vector<128x63xf32>
    %c1_6 = arith.constant 1 : index
    %c0_7 = arith.constant 0 : index
    %c0_8 = arith.constant 0 : index
    %7 = vector.load %arg1[%c1_6, %c0_7, %c0_8] : memref<9x32x128xf32, #tpu.memory_space<vmem>>, vector<1x32x128xf32>
    %8 = vector.shape_cast %7 : vector<1x32x128xf32> to vector<32x128xf32>
    %cst_9 = arith.constant dense<0.000000e+00> : vector<32x63xf32>
    %9 = tpu.matmul %8, %6, %cst_9 {dimension_numbers = #tpu.dot_dimension_numbers<[1], [0], [0], [1], [0, 0, 1, 1], [], []>} : vector<32x128xf32>, vector<128x63xf32>, vector<32x63xf32> -> vector<32x63xf32>
    %10 = arith.addf %5, %9 : vector<32x63xf32>
    %c0_10 = arith.constant 0 : index
    %c2 = arith.constant 2 : index
    %11 = vector.load %arg0[%c0_10, %c2] : memref<128x90xf32, #tpu.memory_space<vmem>>, vector<128x63xf32>
    %c2_11 = arith.constant 2 : index
    %c0_12 = arith.constant 0 : index
    %c0_13 = arith.constant 0 : index
    %12 = vector.load %arg1[%c2_11, %c0_12, %c0_13] : memref<9x32x128xf32, #tpu.memory_space<vmem>>, vector<1x32x128xf32>
    %13 = vector.shape_cast %12 : vector<1x32x128xf32> to vector<32x128xf32>
    %cst_14 = arith.constant dense<0.000000e+00> : vector<32x63xf32>
    %14 = tpu.matmul %13, %11, %cst_14 {dimension_numbers = #tpu.dot_dimension_numbers<[1], [0], [0], [1], [0, 0, 1, 1], [], []>} : vector<32x128xf32>, vector<128x63xf32>, vector<32x63xf32> -> vector<32x63xf32>
    %15 = arith.addf %10, %14 : vector<32x63xf32>
    %c0_15 = arith.constant 0 : index
    %c9 = arith.constant 9 : index
    %16 = vector.load %arg0[%c0_15, %c9] : memref<128x90xf32, #tpu.memory_space<vmem>>, vector<128x63xf32>
    %c3 = arith.constant 3 : index
    %c0_16 = arith.constant 0 : index
    %c0_17 = arith.constant 0 : index
    %17 = vector.load %arg1[%c3, %c0_16, %c0_17] : memref<9x32x128xf32, #tpu.memory_space<vmem>>, vector<1x32x128xf32>
    %18 = vector.shape_cast %17 : vector<1x32x128xf32> to vector<32x128xf32>
    %cst_18 = arith.constant dense<0.000000e+00> : vector<32x63xf32>
    %19 = tpu.matmul %18, %16, %cst_18 {dimension_numbers = #tpu.dot_dimension_numbers<[1], [0], [0], [1], [0, 0, 1, 1], [], []>} : vector<32x128xf32>, vector<128x63xf32>, vector<32x63xf32> -> vector<32x63xf32>
    %20 = arith.addf %15, %19 : vector<32x63xf32>
    %c0_19 = arith.constant 0 : index
    %c10 = arith.constant 10 : index
    %21 = vector.load %arg0[%c0_19, %c10] : memref<128x90xf32, #tpu.memory_space<vmem>>, vector<128x63xf32>
    %c4 = arith.constant 4 : index
    %c0_20 = arith.constant 0 : index
    %c0_21 = arith.constant 0 : index
    %22 = vector.load %arg1[%c4, %c0_20, %c0_21] : memref<9x32x128xf32, #tpu.memory_space<vmem>>, vector<1x32x128xf32>
    %23 = vector.shape_cast %22 : vector<1x32x128xf32> to vector<32x128xf32>
    %cst_22 = arith.constant dense<0.000000e+00> : vector<32x63xf32>
    %24 = tpu.matmul %23, %21, %cst_22 {dimension_numbers = #tpu.dot_dimension_numbers<[1], [0], [0], [1], [0, 0, 1, 1], [], []>} : vector<32x128xf32>, vector<128x63xf32>, vector<32x63xf32> -> vector<32x63xf32>
    %25 = arith.addf %20, %24 : vector<32x63xf32>
    %c0_23 = arith.constant 0 : index
    %c11 = arith.constant 11 : index
    %26 = vector.load %arg0[%c0_23, %c11] : memref<128x90xf32, #tpu.memory_space<vmem>>, vector<128x63xf32>
    %c5 = arith.constant 5 : index
    %c0_24 = arith.constant 0 : index
    %c0_25 = arith.constant 0 : index
    %27 = vector.load %arg1[%c5, %c0_24, %c0_25] : memref<9x32x128xf32, #tpu.memory_space<vmem>>, vector<1x32x128xf32>
    %28 = vector.shape_cast %27 : vector<1x32x128xf32> to vector<32x128xf32>
    %cst_26 = arith.constant dense<0.000000e+00> : vector<32x63xf32>
    %29 = tpu.matmul %28, %26, %cst_26 {dimension_numbers = #tpu.dot_dimension_numbers<[1], [0], [0], [1], [0, 0, 1, 1], [], []>} : vector<32x128xf32>, vector<128x63xf32>, vector<32x63xf32> -> vector<32x63xf32>
    %30 = arith.addf %25, %29 : vector<32x63xf32>
    %c0_27 = arith.constant 0 : index
    %c18 = arith.constant 18 : index
    %31 = vector.load %arg0[%c0_27, %c18] : memref<128x90xf32, #tpu.memory_space<vmem>>, vector<128x63xf32>
    %c6 = arith.constant 6 : index
    %c0_28 = arith.constant 0 : index
    %c0_29 = arith.constant 0 : index
    %32 = vector.load %arg1[%c6, %c0_28, %c0_29] : memref<9x32x128xf32, #tpu.memory_space<vmem>>, vector<1x32x128xf32>
    %33 = vector.shape_cast %32 : vector<1x32x128xf32> to vector<32x128xf32>
    %cst_30 = arith.constant dense<0.000000e+00> : vector<32x63xf32>
    %34 = tpu.matmul %33, %31, %cst_30 {dimension_numbers = #tpu.dot_dimension_numbers<[1], [0], [0], [1], [0, 0, 1, 1], [], []>} : vector<32x128xf32>, vector<128x63xf32>, vector<32x63xf32> -> vector<32x63xf32>
    %35 = arith.addf %30, %34 : vector<32x63xf32>
    %c0_31 = arith.constant 0 : index
    %c19 = arith.constant 19 : index
    %36 = vector.load %arg0[%c0_31, %c19] : memref<128x90xf32, #tpu.memory_space<vmem>>, vector<128x63xf32>
    %c7 = arith.constant 7 : index
    %c0_32 = arith.constant 0 : index
    %c0_33 = arith.constant 0 : index
    %37 = vector.load %arg1[%c7, %c0_32, %c0_33] : memref<9x32x128xf32, #tpu.memory_space<vmem>>, vector<1x32x128xf32>
    %38 = vector.shape_cast %37 : vector<1x32x128xf32> to vector<32x128xf32>
    %cst_34 = arith.constant dense<0.000000e+00> : vector<32x63xf32>
    %39 = tpu.matmul %38, %36, %cst_34 {dimension_numbers = #tpu.dot_dimension_numbers<[1], [0], [0], [1], [0, 0, 1, 1], [], []>} : vector<32x128xf32>, vector<128x63xf32>, vector<32x63xf32> -> vector<32x63xf32>
    %40 = arith.addf %35, %39 : vector<32x63xf32>
    %c0_35 = arith.constant 0 : index
    %c20 = arith.constant 20 : index
    %41 = vector.load %arg0[%c0_35, %c20] : memref<128x90xf32, #tpu.memory_space<vmem>>, vector<128x63xf32>
    %c8 = arith.constant 8 : index
    %c0_36 = arith.constant 0 : index
    %c0_37 = arith.constant 0 : index
    %42 = vector.load %arg1[%c8, %c0_36, %c0_37] : memref<9x32x128xf32, #tpu.memory_space<vmem>>, vector<1x32x128xf32>
    %43 = vector.shape_cast %42 : vector<1x32x128xf32> to vector<32x128xf32>
    %cst_38 = arith.constant dense<0.000000e+00> : vector<32x63xf32>
    %44 = tpu.matmul %43, %41, %cst_38 {dimension_numbers = #tpu.dot_dimension_numbers<[1], [0], [0], [1], [0, 0, 1, 1], [], []>} : vector<32x128xf32>, vector<128x63xf32>, vector<32x63xf32> -> vector<32x63xf32>
    %45 = arith.addf %40, %44 : vector<32x63xf32>
    %c0_39 = arith.constant 0 : index
    %c0_40 = arith.constant 0 : index
    %46 = vector.load %arg2[%c0_39, %c0_40] : memref<32x63xf32, #tpu.memory_space<vmem>>, vector<32x63xf32>
    tpu.vector_store %arg2[%c0_39, %c0_40], %45 {strides = array<i32>} : memref<32x63xf32, #tpu.memory_space<vmem>>, vector<32x63xf32>,
    return
  }
}

</mosaic_0001>

<bundles_post_ra>
// kernel: conv2d_3x3_same.1
= control target key start
LH: loop header
LB: loop body
LE: loop exit
PB: predicated region body
PF: predicated region fallthrough
CT: control target
= control target key end

     0   :  { %s1867_s13 = smov 127   ;;  %s1869_s19 = smov 119   ;;  %vm1264_vm0 = vcmask 515072   ;;  %s2378_s0 = inlined_call_operand.vmem [shape: f32[128,90], index: 0, kind: input, shape index: {}]   ;;  %s2379_s1 = inlined_call_operand.vmem [shape: f32[9,32,128], index: 1, kind: input, shape index: {}]   ;;  %s2380_s2 = inlined_call_operand.vmem [shape: f32[32,63], index: 2, kind: output, shape index: {}]  }
   0x1   :  { %v1893_v0 = vld [vmem:[%s2378_s0 + $0x78] sm:$0xff]  ;;  %v1898_v1 = vld [vmem:[%s2378_s0 + $0x68] sm:$0xff]  ;;  %v1907_v2 = vld [vmem:[%s2378_s0 + $0x70] sm:$0xff]  ;;  %s1870_s27 = smov 118   ;;  %s1871_s28 = smov 117  }
   0x2   :  { %82 = vrot.lane.b32.xlu0 %v1893_v0, %s1867_s13  ;;  %78 = vrot.lane.b32.xlu1 %v1898_v1, %s1867_s13  ;;  %v1912_v3 = vld [vmem:[%s2378_s0 + $0x60] sm:$0xff]  ;;  %v1924_v4 = vld [vmem:[%s2378_s0 + $0x58] sm:$0xff]  ;;  %s1872_s9 = smov 110   ;;  %s1873_s10 = smov 109  }
   0x3   :  { %1523 = vmatprep.subr.mxu1 %v1893_v0  ;;  %v1929_v5 = vld [vmem:[%s2378_s0 + $0x50] sm:$0xff]  ;;  %v1941_v6 = vld [vmem:[%s2378_s0 + $0x48] sm:$0xff]  ;;  %v1946_v7 = vld [vmem:[%s2378_s0 + $0x40] sm:$0xff]  ;;  %s1874_s26 = smov 108  }
   0x4   :  { %1524 = vmatpush3.msra.mxu1 %v1893_v0  ;;  %v1958_v8 = vld [vmem:[%s2378_s0 + $0x38] sm:$0xff]  ;;  %v1963_v9 = vld [vmem:[%s2378_s0 + $0x30] sm:$0xff]  ;;  %v1975_v10 = vld [vmem:[%s2378_s0 + $0x28] sm:$0xff] }
   0x5   :  { %1525 = vmatprep.subr.mxu1 %v1907_v2  ;;  %v1980_v11 = vld [vmem:[%s2378_s0 + $0x20] sm:$0xff]  ;;  %v1998_v14 = vld [vmem:[%s2378_s0 + $0x18] sm:$0xff]  ;;  %v2003_v15 = vld [vmem:[%s2378_s0 + $0x10] sm:$0xff] }
   0x6   :  { %80 = vrot.lane.b32.xlu0 %v1907_v2, %s1867_s13  ;;  %76 = vrot.lane.b32.xlu1 %v1912_v3, %s1867_s13  ;;  %v27_v12 = vld [vmem:[%s2379_s1] sm:$0xff]  ;;  %v2015_v16 = vld [vmem:[%s2378_s0 + $0x8] sm:$0xff] }
   0x7   :  { %1526 = vmatpush3.msra.mxu1 %v1907_v2  ;;  %v1273_v13 = vld [vmem:[%s2379_s1 + $0x20] sm:$0xff]  ;;  %1555 = vmatprep.mubr.f32.mxu1 %v27_v12  ;;  %v28_v18 = vld [vmem:[%s2379_s1 + $0x8] sm:$0xff]  ;;  %v29_v19 = vld [vmem:[%s2379_s1 + $0x10] sm:$0xff] }
   0x8   :  { %1527 = vmatprep.subr.mxu1 %v1898_v1  ;;  %1517 = vmatprep.mubr.f32.mxu0 %v1273_v13  ;;  %v2020_v17 = vld [vmem:[%s2378_s0] sm:$0xff]  ;;  %s1868_s0 = smov 126   ;;  %v30_v20 = vld [vmem:[%s2379_s1 + $0x18] sm:$0xff]  ;;  %v1274_v40 = vld [vmem:[%s2379_s1 + $0x28] sm:$0xff] }
   0x9   :  { %1528 = vmatpush3.msra.mxu1 %v1898_v1  ;;  %v1281_v21 = vld [vmem:[%s2379_s1 + $0x60] sm:$0xff]  ;;  %v1275_v43 = vld [vmem:[%s2379_s1 + $0x30] sm:$0xff]  ;;  %v1276_v46 = vld [vmem:[%s2379_s1 + $0x38] sm:$0xff] }
   0xa   :  { %74 = vrot.lane.b32.xlu0 %v1924_v4, %s1867_s13  ;;  %72 = vrot.lane.b32.xlu1 %v1929_v5, %s1867_s13  ;;  %v1277_v49 = vld [vmem:[%s2379_s1 + $0x40] sm:$0xff] }
   0xb   :  { %1529 = vmatprep.subr.mxu1 %v1912_v3 }
   0xc   :  { %1530 = vmatpush3.msra.mxu1 %v1912_v3 }
   0xd   :  { %1531 = vmatprep.subr.mxu1 %v1924_v4 }
   0xe   :  { %70 = vrot.lane.b32.xlu0 %v1941_v6, %s1867_s13  ;;  %68 = vrot.lane.b32.xlu1 %v1946_v7, %s1867_s13 }
   0xf   :  { %1532 = vmatpush3.msra.mxu1 %v1924_v4 }
  0x10   :  { %1533 = vmatprep.subr.mxu1 %v1929_v5 }
  0x11   :  { %1534 = vmatpush3.msra.mxu1 %v1929_v5 }
  0x12   :  { %66 = vrot.lane.b32.xlu0 %v1958_v8, %s1867_s13  ;;  %64 = vrot.lane.b32.xlu1 %v1963_v9, %s1867_s13 }
  0x13   :  { %1535 = vmatprep.subr.mxu1 %v1941_v6 }
  0x14   :  { %1536 = vmatpush3.msra.mxu1 %v1941_v6 }
  0x15   :  { %1537 = vmatprep.subr.mxu1 %v1946_v7 }
  0x16   :  { %62 = vrot.lane.b32.xlu0 %v1975_v10, %s1867_s13  ;;  %60 = vrot.lane.b32.xlu1 %v1980_v11, %s1867_s13 }
  0x17   :  { %1538 = vmatpush3.msra.mxu1 %v1946_v7 }
  0x18   :  { %1539 = vmatprep.subr.mxu1 %v1958_v8 }
  0x19   :  { %1540 = vmatpush3.msra.mxu1 %v1958_v8 }
  0x1a   :  { %58 = vrot.lane.b32.xlu0 %v1998_v14, %s1867_s13  ;;  %56 = vrot.lane.b32.xlu1 %v2003_v15, %s1867_s13 }
  0x1b   :  { %1541 = vmatprep.subr.mxu1 %v1963_v9 }
  0x1c   :  { %1542 = vmatpush3.msra.mxu1 %v1963_v9 }
  0x1d   :  { %1543 = vmatprep.subr.mxu1 %v1975_v10 }
  0x1e   :  { %54 = vrot.lane.b32.xlu0 %v2015_v16, %s1867_s13  ;;  %52 = vrot.lane.b32.xlu1 %v2020_v17, %s1867_s13 }
  0x1f   :  { %1544 = vmatpush3.msra.mxu1 %v1975_v10 }
  0x20   :  { %1545 = vmatprep.subr.mxu1 %v1980_v11 }
  0x21   :  { %1546 = vmatpush3.msra.mxu1 %v1980_v11 }
  0x22   :  { %305 = vrot.lane.b32.xlu0 %v1893_v0, %s1868_s0  ;;  %447 = vrot.lane.b32.xlu1 %v1893_v0, %s1869_s19 }
  0x23   :  { %1547 = vmatprep.subr.mxu1 %v1998_v14 }
  0x24   :  { %1548 = vmatpush3.msra.mxu1 %v1998_v14 }
  0x25   :  { %1549 = vmatprep.subr.mxu1 %v2003_v15 }
  0x26   :  { %303 = vrot.lane.b32.xlu0 %v1907_v2, %s1868_s0  ;;  %445 = vrot.lane.b32.xlu1 %v1907_v2, %s1869_s19 }
  0x27   :  { %1550 = vmatpush3.msra.mxu1 %v2003_v15 }
  0x28   :  { %1551 = vmatprep.subr.mxu1 %v2015_v16 }
  0x29   :  { %1552 = vmatpush3.msra.mxu1 %v2015_v16 }
  0x2a   :  { %301 = vrot.lane.b32.xlu0 %v1898_v1, %s1868_s0  ;;  %443 = vrot.lane.b32.xlu1 %v1898_v1, %s1869_s19 }
  0x2b   :  { %1553 = vmatprep.subr.mxu1 %v2020_v17 }
  0x2c   :  { %1554 = vmatpush3.msra.mxu1 %v2020_v17 }
  0x2d   :  { %1556 = vmatmul.mubr.f32.vlgmr.msra.gmra.mxu1 %v28_v18 }
  0x2e   :  { %299 = vrot.lane.b32.xlu0 %v1912_v3, %s1868_s0  ;;  %441 = vrot.lane.b32.xlu1 %v1912_v3, %s1869_s19 }
  0x2f   :  { %1558 = vmatprep.mubr.f32.mxu1 %v29_v19 }
  0x31   :  { %1559 = vmatmul.mubr.f32.gmra.mxu1 %v30_v20 }
  0x32   :  { %297 = vrot.lane.b32.xlu0 %v1924_v4, %s1868_s0  ;;  %439 = vrot.lane.b32.xlu1 %v1924_v4, %s1869_s19 }
  0x33   :  { %1631 = vmatprep.mubr.f32.mxu1 %v1281_v21 }
  0x36   :  { %295 = vrot.lane.b32.xlu0 %v1929_v5, %s1868_s0  ;;  %437 = vrot.lane.b32.xlu1 %v1929_v5, %s1869_s19 }
  0x3a   :  { %293 = vrot.lane.b32.xlu0 %v1941_v6, %s1868_s0  ;;  %435 = vrot.lane.b32.xlu1 %v1941_v6, %s1869_s19 }
  0x3e   :  { %291 = vrot.lane.b32.xlu0 %v1946_v7, %s1868_s0  ;;  %433 = vrot.lane.b32.xlu1 %v1946_v7, %s1869_s19 }
  0x42   :  { %289 = vrot.lane.b32.xlu0 %v1958_v8, %s1868_s0  ;;  %431 = vrot.lane.b32.xlu1 %v1958_v8, %s1869_s19 }
  0x46   :  { %287 = vrot.lane.b32.xlu0 %v1963_v9, %s1868_s0  ;;  %429 = vrot.lane.b32.xlu1 %v1963_v9, %s1869_s19 }
  0x4a   :  { %285 = vrot.lane.b32.xlu0 %v1975_v10, %s1868_s0  ;;  %427 = vrot.lane.b32.xlu1 %v1975_v10, %s1869_s19 }
  0x4e   :  { %283 = vrot.lane.b32.xlu0 %v1980_v11, %s1868_s0  ;;  %425 = vrot.lane.b32.xlu1 %v1980_v11, %s1869_s19 }
  0x52   :  { %281 = vrot.lane.b32.xlu0 %v1998_v14, %s1868_s0  ;;  %423 = vrot.lane.b32.xlu1 %v1998_v14, %s1869_s19 }
  0x56   :  { %279 = vrot.lane.b32.xlu0 %v2003_v15, %s1868_s0  ;;  %421 = vrot.lane.b32.xlu1 %v2003_v15, %s1869_s19 }
  0x5a   :  { %277 = vrot.lane.b32.xlu0 %v2015_v16, %s1868_s0  ;;  %419 = vrot.lane.b32.xlu1 %v2015_v16, %s1869_s19 }
  0x5e   :  { %275 = vrot.lane.b32.xlu0 %v2020_v17, %s1868_s0  ;;  %417 = vrot.lane.b32.xlu1 %v2020_v17, %s1869_s19 }
  0x62   :  { %589 = vrot.lane.b32.xlu0 %v1893_v0, %s1870_s27  ;;  %731 = vrot.lane.b32.xlu1 %v1893_v0, %s1871_s28 }
  0x66   :  { %587 = vrot.lane.b32.xlu0 %v1907_v2, %s1870_s27  ;;  %729 = vrot.lane.b32.xlu1 %v1907_v2, %s1871_s28 }
  0x6a   :  { %585 = vrot.lane.b32.xlu0 %v1898_v1, %s1870_s27  ;;  %727 = vrot.lane.b32.xlu1 %v1898_v1, %s1871_s28 }
  0x6e   :  { %583 = vrot.lane.b32.xlu0 %v1912_v3, %s1870_s27  ;;  %725 = vrot.lane.b32.xlu1 %v1912_v3, %s1871_s28 }
  0x72   :  { %581 = vrot.lane.b32.xlu0 %v1924_v4, %s1870_s27  ;;  %723 = vrot.lane.b32.xlu1 %v1924_v4, %s1871_s28 }
  0x74   :  { %v83_v22 = vpop.permute.xlu0 %82  ;;  %v79_v23 = vpop.permute.xlu1 %78 }
  0x75   :  { %1485 = vmatprep.subr.mxu0 %v83_v22 }
  0x76   :  { %1486 = vmatpush3.msra.mxu0 %v83_v22  ;;  %579 = vrot.lane.b32.xlu0 %v1929_v5, %s1870_s27 }
  0x77   :  { %721 = vrot.lane.b32.xlu1 %v1929_v5, %s1871_s28 }
  0x78   :  { %v81_v24 = vpop.permute.xlu0 %80  ;;  %v77_v25 = vpop.permute.xlu1 %76 }
  0x79   :  { %1487 = vmatprep.subr.mxu0 %v81_v24 }
  0x7a   :  { %1488 = vmatpush3.msra.mxu0 %v81_v24  ;;  %577 = vrot.lane.b32.xlu0 %v1941_v6, %s1870_s27 }
  0x7b   :  { %1489 = vmatprep.subr.mxu0 %v79_v23  ;;  %719 = vrot.lane.b32.xlu1 %v1941_v6, %s1871_s28 }
  0x7c   :  { %1490 = vmatpush3.msra.mxu0 %v79_v23  ;;  %v75_v26 = vpop.permute.xlu0 %74  ;;  %v73_v27 = vpop.permute.xlu1 %72 }
  0x7d   :  { %1491 = vmatprep.subr.mxu0 %v77_v25 }
  0x7e   :  { %1492 = vmatpush3.msra.mxu0 %v77_v25  ;;  %575 = vrot.lane.b32.xlu0 %v1946_v7, %s1870_s27 }
  0x7f   :  { %1493 = vmatprep.subr.mxu0 %v75_v26  ;;  %717 = vrot.lane.b32.xlu1 %v1946_v7, %s1871_s28 }
  0x80   :  { %1494 = vmatpush3.msra.mxu0 %v75_v26  ;;  %v71_v28 = vpop.permute.xlu0 %70  ;;  %v69_v29 = vpop.permute.xlu1 %68  ;;  %v1278_v26 = vld [vmem:[%s2379_s1 + $0x48] sm:$0xff] }
  0x81   :  { %1495 = vmatprep.subr.mxu0 %v73_v27 }
  0x82   :  { %1496 = vmatpush3.msra.mxu0 %v73_v27  ;;  %573 = vrot.lane.b32.xlu0 %v1958_v8, %s1870_s27  ;;  %v1282_v27 = vld [vmem:[%s2379_s1 + $0x68] sm:$0xff] }
  0x83   :  { %1497 = vmatprep.subr.mxu0 %v71_v28  ;;  %715 = vrot.lane.b32.xlu1 %v1958_v8, %s1871_s28 }
  0x84   :  { %1498 = vmatpush3.msra.mxu0 %v71_v28  ;;  %v67_v30 = vpop.permute.xlu0 %66  ;;  %v65_v31 = vpop.permute.xlu1 %64 }
  0x85   :  { %1499 = vmatprep.subr.mxu0 %v69_v29 }
  0x86   :  { %1500 = vmatpush3.msra.mxu0 %v69_v29  ;;  %571 = vrot.lane.b32.xlu0 %v1963_v9, %s1870_s27 }
  0x87   :  { %1501 = vmatprep.subr.mxu0 %v67_v30  ;;  %713 = vrot.lane.b32.xlu1 %v1963_v9, %s1871_s28 }
  0x88   :  { %1502 = vmatpush3.msra.mxu0 %v67_v30  ;;  %v63_v32 = vpop.permute.xlu0 %62  ;;  %v61_v33 = vpop.permute.xlu1 %60  ;;  %v1279_v30 = vld [vmem:[%s2379_s1 + $0x50] sm:$0xff] }
  0x89   :  { %1503 = vmatprep.subr.mxu0 %v65_v31 }
  0x8a   :  { %1504 = vmatpush3.msra.mxu0 %v65_v31  ;;  %569 = vrot.lane.b32.xlu0 %v1975_v10, %s1870_s27  ;;  %v1283_v31 = vld [vmem:[%s2379_s1 + $0x70] sm:$0xff] }
  0x8b   :  { %1505 = vmatprep.subr.mxu0 %v63_v32  ;;  %711 = vrot.lane.b32.xlu1 %v1975_v10, %s1871_s28 }
  0x8c   :  { %1506 = vmatpush3.msra.mxu0 %v63_v32  ;;  %v59_v34 = vpop.permute.xlu0 %58  ;;  %v57_v35 = vpop.permute.xlu1 %56 }
  0x8d   :  { %1507 = vmatprep.subr.mxu0 %v61_v33 }
  0x8e   :  { %1508 = vmatpush3.msra.mxu0 %v61_v33  ;;  %567 = vrot.lane.b32.xlu0 %v1980_v11, %s1870_s27 }
  0x8f   :  { %1509 = vmatprep.subr.mxu0 %v59_v34  ;;  %709 = vrot.lane.b32.xlu1 %v1980_v11, %s1871_s28 }
  0x90   :  { %1510 = vmatpush3.msra.mxu0 %v59_v34  ;;  %v55_v36 = vpop.permute.xlu0 %54  ;;  %v53_v37 = vpop.permute.xlu1 %52  ;;  %v1280_v34 = vld [vmem:[%s2379_s1 + $0x58] sm:$0xff] }
  0x91   :  { %1511 = vmatprep.subr.mxu0 %v57_v35 }
  0x92   :  { %1512 = vmatpush3.msra.mxu0 %v57_v35  ;;  %565 = vrot.lane.b32.xlu0 %v1998_v14, %s1870_s27  ;;  %v1284_v35 = vld [vmem:[%s2379_s1 + $0x78] sm:$0xff] }
  0x93   :  { %1513 = vmatprep.subr.mxu0 %v55_v36  ;;  %707 = vrot.lane.b32.xlu1 %v1998_v14, %s1871_s28 }
  0x94   :  { %1514 = vmatpush3.msra.mxu0 %v55_v36  ;;  %v306_v38 = vpop.permute.xlu0 %305  ;;  %v448_v39 = vpop.permute.xlu1 %447 }
  0x95   :  { %1515 = vmatprep.subr.mxu0 %v53_v37  ;;  %1599 = vmatprep.subr.mxu1 %v448_v39 }
  0x96   :  { %563 = vrot.lane.b32.xlu0 %v2003_v15, %s1870_s27  ;;  %1516 = vmatpush3.msra.mxu0 %v53_v37 }
  0x97   :  { %705 = vrot.lane.b32.xlu1 %v2003_v15, %s1871_s28  ;;  %1561 = vmatprep.subr.mxu0 %v306_v38 }
  0x98   :  { %1600 = vmatpush3.msra.mxu1 %v448_v39  ;;  %v304_v41 = vpop.permute.xlu0 %303  ;;  %1518 = vmatmul.mubr.f32.vlgmr.msra.gmra.mxu0 %v1274_v40  ;;  %v446_v42 = vpop.permute.xlu1 %445  ;;  %v1289_v39 = vld [vmem:[%s2379_s1 + $0xa0] sm:$0xff] }
  0x99   :  { %1562 = vmatpush3.msra.mxu0 %v306_v38  ;;  %1601 = vmatprep.subr.mxu1 %v446_v42  ;;  %v1285_v38 = vld [vmem:[%s2379_s1 + $0x80] sm:$0xff] }
  0x9a   :  { %1563 = vmatprep.subr.mxu0 %v304_v41  ;;  %561 = vrot.lane.b32.xlu0 %v2015_v16, %s1870_s27 }
  0x9b   :  { %1564 = vmatpush3.msra.mxu0 %v304_v41  ;;  %703 = vrot.lane.b32.xlu1 %v2015_v16, %s1871_s28 }
  0x9c   :  { %1602 = vmatpush3.msra.mxu1 %v446_v42  ;;  %v302_v44 = vpop.permute.xlu0 %301  ;;  %v444_v45 = vpop.permute.xlu1 %443  ;;  %1520 = vmatprep.mubr.f32.mxu0 %v1275_v43 }
  0x9d   :  { %1565 = vmatprep.subr.mxu0 %v302_v44  ;;  %1603 = vmatprep.subr.mxu1 %v444_v45 }
  0x9e   :  { %559 = vrot.lane.b32.xlu0 %v2020_v17, %s1870_s27  ;;  %1566 = vmatpush3.msra.mxu0 %v302_v44 }
  0x9f   :  { %701 = vrot.lane.b32.xlu1 %v2020_v17, %s1871_s28  ;;  %1604 = vmatpush3.msra.mxu1 %v444_v45 }
  0xa0   :  { %v300_v47 = vpop.permute.xlu0 %299  ;;  %v442_v48 = vpop.permute.xlu1 %441  ;;  %1521 = vmatmul.mubr.f32.gmra.mxu0 %v1276_v46 }
  0xa1   :  { %1567 = vmatprep.subr.mxu0 %v300_v47  ;;  %1605 = vmatprep.subr.mxu1 %v442_v48 }
  0xa2   :  { %873 = vrot.lane.b32.xlu0 %v1893_v0, %s1872_s9  ;;  %1568 = vmatpush3.msra.mxu0 %v300_v47 }
  0xa3   :  { %1015 = vrot.lane.b32.xlu1 %v1893_v0, %s1873_s10  ;;  %1606 = vmatpush3.msra.mxu1 %v442_v48 }
  0xa4   :  { %v298_v50 = vpop.permute.xlu0 %297  ;;  %v440_v51 = vpop.permute.xlu1 %439  ;;  %1593 = vmatprep.mubr.f32.mxu0 %v1277_v49  ;;  %v1286_v49 = vld [vmem:[%s2379_s1 + $0x88] sm:$0xff] }
  0xa5   :  { %1569 = vmatprep.subr.mxu0 %v298_v50  ;;  %1607 = vmatprep.subr.mxu1 %v440_v51 }
  0xa6   :  { %871 = vrot.lane.b32.xlu0 %v1907_v2, %s1872_s9  ;;  %1570 = vmatpush3.msra.mxu0 %v298_v50 }
  0xa7   :  { %1013 = vrot.lane.b32.xlu1 %v1907_v2, %s1873_s10  ;;  %1608 = vmatpush3.msra.mxu1 %v440_v51  ;;  %v1290_v51 = vld [vmem:[%s2379_s1 + $0xa8] sm:$0xff] }
  0xa8   :  { %v296_v52 = vpop.permute.xlu0 %295  ;;  %v438_v53 = vpop.permute.xlu1 %437 }
  0xa9   :  { %1571 = vmatprep.subr.mxu0 %v296_v52  ;;  %1609 = vmatprep.subr.mxu1 %v438_v53 }
  0xaa   :  { %869 = vrot.lane.b32.xlu0 %v1898_v1, %s1872_s9  ;;  %1572 = vmatpush3.msra.mxu0 %v296_v52  ;;  %v1287_v52 = vld [vmem:[%s2379_s1 + $0x90] sm:$0xff] }
  0xab   :  { %1011 = vrot.lane.b32.xlu1 %v1898_v1, %s1873_s10  ;;  %1610 = vmatpush3.msra.mxu1 %v438_v53  ;;  %v1291_v53 = vld [vmem:[%s2379_s1 + $0xb0] sm:$0xff] }
  0xac   :  { %v294_v54 = vpop.permute.xlu0 %293  ;;  %v436_v55 = vpop.permute.xlu1 %435 }
  0xad   :  { %1573 = vmatprep.subr.mxu0 %v294_v54  ;;  %1611 = vmatprep.subr.mxu1 %v436_v55 }
  0xae   :  { %867 = vrot.lane.b32.xlu0 %v1912_v3, %s1872_s9  ;;  %1574 = vmatpush3.msra.mxu0 %v294_v54 }
  0xaf   :  { %1009 = vrot.lane.b32.xlu1 %v1912_v3, %s1873_s10  ;;  %1612 = vmatpush3.msra.mxu1 %v436_v55  ;;  %v1288_v55 = vld [vmem:[%s2379_s1 + $0x98] sm:$0xff] }
  0xb0   :  { %v292_v56 = vpop.permute.xlu0 %291  ;;  %v434_v57 = vpop.permute.xlu1 %433 }
  0xb1   :  { %1575 = vmatprep.subr.mxu0 %v292_v56  ;;  %1613 = vmatprep.subr.mxu1 %v434_v57 }
  0xb2   :  { %865 = vrot.lane.b32.xlu0 %v1924_v4, %s1872_s9  ;;  %1576 = vmatpush3.msra.mxu0 %v292_v56 }
  0xb3   :  { %1007 = vrot.lane.b32.xlu1 %v1924_v4, %s1873_s10  ;;  %1614 = vmatpush3.msra.mxu1 %v434_v57  ;;  %v1292_v57 = vld [vmem:[%s2379_s1 + $0xb8] sm:$0xff] }
  0xb4   :  { %v290_v58 = vpop.permute.xlu0 %289  ;;  %v432_v59 = vpop.permute.xlu1 %431 }
  0xb5   :  { %1577 = vmatprep.subr.mxu0 %v290_v58  ;;  %1615 = vmatprep.subr.mxu1 %v432_v59 }
  0xb6   :  { %863 = vrot.lane.b32.xlu0 %v1929_v5, %s1872_s9  ;;  %1578 = vmatpush3.msra.mxu0 %v290_v58  ;;  %v1293_v58 = vld [vmem:[%s2379_s1 + $0xc0] sm:$0xff] }
  0xb7   :  { %1005 = vrot.lane.b32.xlu1 %v1929_v5, %s1873_s10  ;;  %1616 = vmatpush3.msra.mxu1 %v432_v59  ;;  %v1297_v59 = vld [vmem:[%s2379_s1 + $0xe0] sm:$0xff] }
  0xb8   :  { %v288_v60 = vpop.permute.xlu0 %287  ;;  %v430_v61 = vpop.permute.xlu1 %429 }
  0xb9   :  { %1579 = vmatprep.subr.mxu0 %v288_v60  ;;  %1617 = vmatprep.subr.mxu1 %v430_v61 }
  0xba   :  { %861 = vrot.lane.b32.xlu0 %v1941_v6, %s1872_s9  ;;  %1580 = vmatpush3.msra.mxu0 %v288_v60 }
  0xbb   :  { %1003 = vrot.lane.b32.xlu1 %v1941_v6, %s1873_s10  ;;  %1618 = vmatpush3.msra.mxu1 %v430_v61 }
  0xbc   :  { %v286_v62 = vpop.permute.xlu0 %285  ;;  %v428_v63 = vpop.permute.xlu1 %427 }
  0xbd   :  { %1581 = vmatprep.subr.mxu0 %v286_v62  ;;  %1619 = vmatprep.subr.mxu1 %v428_v63 }
  0xbe   :  { %859 = vrot.lane.b32.xlu0 %v1946_v7, %s1872_s9  ;;  %1582 = vmatpush3.msra.mxu0 %v286_v62 }
  0xbf   :  { %1001 = vrot.lane.b32.xlu1 %v1946_v7, %s1873_s10  ;;  %1620 = vmatpush3.msra.mxu1 %v428_v63 }
  0xc0   :  { %v284_v12 = vpop.permute.xlu0 %283  ;;  %v426_v13 = vpop.permute.xlu1 %425 }
  0xc1   :  { %1583 = vmatprep.subr.mxu0 %v284_v12  ;;  %1621 = vmatprep.subr.mxu1 %v426_v13 }
  0xc2   :  { %857 = vrot.lane.b32.xlu0 %v1958_v8, %s1872_s9  ;;  %1584 = vmatpush3.msra.mxu0 %v284_v12 }
  0xc3   :  { %999 = vrot.lane.b32.xlu1 %v1958_v8, %s1873_s10  ;;  %1622 = vmatpush3.msra.mxu1 %v426_v13 }
  0xc4   :  { %v282_v18 = vpop.permute.xlu0 %281  ;;  %v424_v19 = vpop.permute.xlu1 %423 }
  0xc5   :  { %1585 = vmatprep.subr.mxu0 %v282_v18  ;;  %1623 = vmatprep.subr.mxu1 %v424_v19 }
  0xc6   :  { %855 = vrot.lane.b32.xlu0 %v1963_v9, %s1872_s9  ;;  %1586 = vmatpush3.msra.mxu0 %v282_v18 }
  0xc7   :  { %997 = vrot.lane.b32.xlu1 %v1963_v9, %s1873_s10  ;;  %1624 = vmatpush3.msra.mxu1 %v424_v19 }
  0xc8   :  { %v280_v20 = vpop.permute.xlu0 %279  ;;  %v422_v21 = vpop.permute.xlu1 %421 }
  0xc9   :  { %1587 = vmatprep.subr.mxu0 %v280_v20  ;;  %1625 = vmatprep.subr.mxu1 %v422_v21 }
  0xca   :  { %853 = vrot.lane.b32.xlu0 %v1975_v10, %s1872_s9  ;;  %1588 = vmatpush3.msra.mxu0 %v280_v20 }
  0xcb   :  { %995 = vrot.lane.b32.xlu1 %v1975_v10, %s1873_s10  ;;  %1626 = vmatpush3.msra.mxu1 %v422_v21 }
  0xcc   :  { %v278_v22 = vpop.permute.xlu0 %277  ;;  %v420_v23 = vpop.permute.xlu1 %419 }
  0xcd   :  { %1589 = vmatprep.subr.mxu0 %v278_v22  ;;  %1627 = vmatprep.subr.mxu1 %v420_v23 }
  0xce   :  { %851 = vrot.lane.b32.xlu0 %v1980_v11, %s1872_s9  ;;  %1590 = vmatpush3.msra.mxu0 %v278_v22 }
  0xcf   :  { %993 = vrot.lane.b32.xlu1 %v1980_v11, %s1873_s10  ;;  %1628 = vmatpush3.msra.mxu1 %v420_v23 }
  0xd0   :  { %v276_v24 = vpop.permute.xlu0 %275  ;;  %v418_v25 = vpop.permute.xlu1 %417 }
  0xd1   :  { %1591 = vmatprep.subr.mxu0 %v276_v24  ;;  %1629 = vmatprep.subr.mxu1 %v418_v25 }
  0xd2   :  { %849 = vrot.lane.b32.xlu0 %v1998_v14, %s1872_s9  ;;  %1592 = vmatpush3.msra.mxu0 %v276_v24 }
  0xd3   :  { %991 = vrot.lane.b32.xlu1 %v1998_v14, %s1873_s10  ;;  %1630 = vmatpush3.msra.mxu1 %v418_v25 }
  0xd4   :  { %v590_v28 = vpop.permute.xlu0 %589  ;;  %v732_v29 = vpop.permute.xlu1 %731  ;;  %1594 = vmatmul.mubr.f32.vlgmr.msra.gmra.mxu0 %v1278_v26  ;;  %1632 = vmatmul.mubr.f32.vlgmr.msra.gmra.mxu1 %v1282_v27 }
  0xd5   :  { %1637 = vmatprep.subr.mxu0 %v590_v28  ;;  %1675 = vmatprep.subr.mxu1 %v732_v29 }
  0xd6   :  { %847 = vrot.lane.b32.xlu0 %v2003_v15, %s1872_s9  ;;  %1638 = vmatpush3.msra.mxu0 %v590_v28 }
  0xd7   :  { %989 = vrot.lane.b32.xlu1 %v2003_v15, %s1873_s10  ;;  %1676 = vmatpush3.msra.mxu1 %v732_v29 }
  0xd8   :  { %v588_v32 = vpop.permute.xlu0 %587  ;;  %v730_v33 = vpop.permute.xlu1 %729  ;;  %1596 = vmatprep.mubr.f32.mxu0 %v1279_v30  ;;  %1634 = vmatprep.mubr.f32.mxu1 %v1283_v31 }
  0xd9   :  { %1639 = vmatprep.subr.mxu0 %v588_v32  ;;  %1677 = vmatprep.subr.mxu1 %v730_v33 }
  0xda   :  { %845 = vrot.lane.b32.xlu0 %v2015_v16, %s1872_s9  ;;  %1640 = vmatpush3.msra.mxu0 %v588_v32 }
  0xdb   :  { %987 = vrot.lane.b32.xlu1 %v2015_v16, %s1873_s10  ;;  %1678 = vmatpush3.msra.mxu1 %v730_v33 }
  0xdc   :  { %v586_v36 = vpop.permute.xlu0 %585  ;;  %v728_v37 = vpop.permute.xlu1 %727  ;;  %1597 = vmatmul.mubr.f32.gmra.mxu0 %v1280_v34  ;;  %1635 = vmatmul.mubr.f32.gmra.mxu1 %v1284_v35 }
  0xdd   :  { %1641 = vmatprep.subr.mxu0 %v586_v36  ;;  %1679 = vmatprep.subr.mxu1 %v728_v37 }
  0xde   :  { %843 = vrot.lane.b32.xlu0 %v2020_v17, %s1872_s9  ;;  %1642 = vmatpush3.msra.mxu0 %v586_v36 }
  0xdf   :  { %985 = vrot.lane.b32.xlu1 %v2020_v17, %s1873_s10  ;;  %1680 = vmatpush3.msra.mxu1 %v728_v37 }
  0xe0   :  { %v584_v40 = vpop.permute.xlu0 %583  ;;  %v726_v41 = vpop.permute.xlu1 %725  ;;  %1669 = vmatprep.mubr.f32.mxu0 %v1285_v38  ;;  %1707 = vmatprep.mubr.f32.mxu1 %v1289_v39 }
  0xe1   :  { %1643 = vmatprep.subr.mxu0 %v584_v40  ;;  %1681 = vmatprep.subr.mxu1 %v726_v41 }
  0xe2   :  { %1157 = vrot.lane.b32.xlu0 %v1893_v0, %s1874_s26  ;;  %1644 = vmatpush3.msra.mxu0 %v584_v40 }
  0xe3   :  { %1682 = vmatpush3.msra.mxu1 %v726_v41  ;;  %1155 = vrot.lane.b32.xlu1 %v1907_v2, %s1874_s26  ;;  %v1294_v41 = vld [vmem:[%s2379_s1 + $0xc8] sm:$0xff] }
  0xe4   :  { %v582_v42 = vpop.permute.xlu0 %581  ;;  %v724_v43 = vpop.permute.xlu1 %723 }
  0xe5   :  { %1645 = vmatprep.subr.mxu0 %v582_v42  ;;  %1683 = vmatprep.subr.mxu1 %v724_v43 }
  0xe6   :  { %1153 = vrot.lane.b32.xlu0 %v1898_v1, %s1874_s26  ;;  %1646 = vmatpush3.msra.mxu0 %v582_v42 }
  0xe7   :  { %1684 = vmatpush3.msra.mxu1 %v724_v43  ;;  %1151 = vrot.lane.b32.xlu1 %v1912_v3, %s1874_s26  ;;  %v1298_v43 = vld [vmem:[%s2379_s1 + $0xe8] sm:$0xff] }
  0xe8   :  { %v580_v44 = vpop.permute.xlu0 %579 }
  0xe9   :  { %1647 = vmatprep.subr.mxu0 %v580_v44  ;;  %v722_v0 = vpop.permute.xlu1 %721 }
  0xea   :  { %1149 = vrot.lane.b32.xlu0 %v1924_v4, %s1874_s26  ;;  %1648 = vmatpush3.msra.mxu0 %v580_v44  ;;  %v1295_v44 = vld [vmem:[%s2379_s1 + $0xd0] sm:$0xff] }
  0xeb   :  { %1685 = vmatprep.subr.mxu1 %v722_v0  ;;  %1147 = vrot.lane.b32.xlu1 %v1929_v5, %s1874_s26 }
  0xec   :  { %1686 = vmatpush3.msra.mxu1 %v722_v0  ;;  %v578_v2 = vpop.permute.xlu0 %577 }
  0xed   :  { %1649 = vmatprep.subr.mxu0 %v578_v2  ;;  %v720_v1 = vpop.permute.xlu1 %719 }
  0xee   :  { %1145 = vrot.lane.b32.xlu0 %v1941_v6, %s1874_s26  ;;  %1650 = vmatpush3.msra.mxu0 %v578_v2  ;;  %v1296_v2 = vld [vmem:[%s2379_s1 + $0xd8] sm:$0xff] }
  0xef   :  { %1687 = vmatprep.subr.mxu1 %v720_v1  ;;  %1143 = vrot.lane.b32.xlu1 %v1946_v7, %s1874_s26 }
  0xf0   :  { %1688 = vmatpush3.msra.mxu1 %v720_v1  ;;  %v576_v3 = vpop.permute.xlu0 %575 }
  0xf1   :  { %1651 = vmatprep.subr.mxu0 %v576_v3  ;;  %v718_v4 = vpop.permute.xlu1 %717 }
  0xf2   :  { %1141 = vrot.lane.b32.xlu0 %v1958_v8, %s1874_s26  ;;  %1652 = vmatpush3.msra.mxu0 %v576_v3  ;;  %v1299_v3 = vld [vmem:[%s2379_s1 + $0xf0] sm:$0xff] }
  0xf3   :  { %1689 = vmatprep.subr.mxu1 %v718_v4  ;;  %1139 = vrot.lane.b32.xlu1 %v1963_v9, %s1874_s26 }
  0xf4   :  { %1690 = vmatpush3.msra.mxu1 %v718_v4  ;;  %v574_v5 = vpop.permute.xlu0 %573  ;;  %v1300_v4 = vld [vmem:[%s2379_s1 + $0xf8] sm:$0xff] }
  0xf5   :  { %1653 = vmatprep.subr.mxu0 %v574_v5  ;;  %v716_v6 = vpop.permute.xlu1 %715 }
  0xf6   :  { %1137 = vrot.lane.b32.xlu0 %v1975_v10, %s1874_s26  ;;  %1654 = vmatpush3.msra.mxu0 %v574_v5 }
  0xf7   :  { %1691 = vmatprep.subr.mxu1 %v716_v6  ;;  %1135 = vrot.lane.b32.xlu1 %v1980_v11, %s1874_s26 }
  0xf8   :  { %1692 = vmatpush3.msra.mxu1 %v716_v6  ;;  %v572_v7 = vpop.permute.xlu0 %571 }
  0xf9   :  { %1655 = vmatprep.subr.mxu0 %v572_v7  ;;  %v714_v8 = vpop.permute.xlu1 %713 }
  0xfa   :  { %1133 = vrot.lane.b32.xlu0 %v1998_v14, %s1874_s26  ;;  %1656 = vmatpush3.msra.mxu0 %v572_v7 }
  0xfb   :  { %1693 = vmatprep.subr.mxu1 %v714_v8  ;;  %1131 = vrot.lane.b32.xlu1 %v2003_v15, %s1874_s26 }
  0xfc   :  { %1694 = vmatpush3.msra.mxu1 %v714_v8  ;;  %v570_v9 = vpop.permute.xlu0 %569 }
  0xfd   :  { %1657 = vmatprep.subr.mxu0 %v570_v9  ;;  %v712_v10 = vpop.permute.xlu1 %711 }
  0xfe   :  { %1129 = vrot.lane.b32.xlu0 %v2015_v16, %s1874_s26  ;;  %1658 = vmatpush3.msra.mxu0 %v570_v9 }
  0xff   :  { %1695 = vmatprep.subr.mxu1 %v712_v10  ;;  %1127 = vrot.lane.b32.xlu1 %v2020_v17, %s1874_s26 }
 0x100   :  { %1696 = vmatpush3.msra.mxu1 %v712_v10  ;;  %v568_v11 = vpop.permute.xlu0 %567 }
 0x101   :  { %1659 = vmatprep.subr.mxu0 %v568_v11  ;;  %v710_v14 = vpop.permute.xlu1 %709 }
 0x102   :  { %1660 = vmatpush3.msra.mxu0 %v568_v11  ;;  %1697 = vmatprep.subr.mxu1 %v710_v14 }
 0x103   :  { %1698 = vmatpush3.msra.mxu1 %v710_v14 }
 0x104   :  { %v566_v15 = vpop.permute.xlu0 %565 }
 0x105   :  { %1661 = vmatprep.subr.mxu0 %v566_v15  ;;  %v708_v45 = vpop.permute.xlu1 %707 }
 0x106   :  { %1662 = vmatpush3.msra.mxu0 %v566_v15  ;;  %1699 = vmatprep.subr.mxu1 %v708_v45 }
 0x107   :  { %1700 = vmatpush3.msra.mxu1 %v708_v45 }
 0x108   :  { %v564_v46 = vpop.permute.xlu0 %563 }
 0x109   :  { %1663 = vmatprep.subr.mxu0 %v564_v46  ;;  %v706_v16 = vpop.permute.xlu1 %705 }
 0x10a   :  { %1664 = vmatpush3.msra.mxu0 %v564_v46  ;;  %1701 = vmatprep.subr.mxu1 %v706_v16 }
 0x10b   :  { %1702 = vmatpush3.msra.mxu1 %v706_v16 }
 0x10c   :  { %v562_v17 = vpop.permute.xlu0 %561 }
 0x10d   :  { %1665 = vmatprep.subr.mxu0 %v562_v17  ;;  %v704_v47 = vpop.permute.xlu1 %703 }
 0x10e   :  { %1666 = vmatpush3.msra.mxu0 %v562_v17  ;;  %1703 = vmatprep.subr.mxu1 %v704_v47 }
 0x10f   :  { %1704 = vmatpush3.msra.mxu1 %v704_v47 }
 0x110   :  { %v560_v48 = vpop.permute.xlu0 %559 }
 0x111   :  { %1667 = vmatprep.subr.mxu0 %v560_v48  ;;  %v702_v50 = vpop.permute.xlu1 %701 }
 0x112   :  { %1668 = vmatpush3.msra.mxu0 %v560_v48  ;;  %1705 = vmatprep.subr.mxu1 %v702_v50  ;;  %v1301_v48 = vld [vmem:[%s2379_s1 + $0x100] sm:$0xff] }
 0x113   :  { %1670 = vmatmul.mubr.f32.vlgmr.msra.gmra.mxu0 %v1286_v49  ;;  %1706 = vmatpush3.msra.mxu1 %v702_v50  ;;  %v1303_v49 = vld [vmem:[%s2379_s1 + $0x110] sm:$0xff]  ;;  %v1302_v50 = vld [vmem:[%s2379_s1 + $0x108] sm:$0xff] }
 0x114   :  { %v874_v54 = vpop.permute.xlu0 %873  ;;  %1708 = vmatmul.mubr.f32.vlgmr.msra.gmra.mxu1 %v1290_v51  ;;  %1672 = vmatprep.mubr.f32.mxu0 %v1287_v52  ;;  %v1304_v51 = vld [vmem:[%s2379_s1 + $0x118] sm:$0xff] }
 0x115   :  { %1713 = vmatprep.subr.mxu0 %v874_v54  ;;  %v1016_v56 = vpop.permute.xlu1 %1015  ;;  %1710 = vmatprep.mubr.f32.mxu1 %v1291_v53 }
 0x116   :  { %1714 = vmatpush3.msra.mxu0 %v874_v54  ;;  %1751 = vmatprep.subr.mxu1 %v1016_v56  ;;  %v1557_v54 = vpop.f32.mrf.mxu1 }
 0x117   :  { %1673 = vmatmul.mubr.f32.gmra.mxu0 %v1288_v55  ;;  %1752 = vmatpush3.msra.mxu1 %v1016_v56 }
 0x118   :  { %v872_v60 = vpop.permute.xlu0 %871  ;;  %1711 = vmatmul.mubr.f32.gmra.mxu1 %v1292_v57  ;;  %1745 = vmatprep.mubr.f32.mxu0 %v1293_v58  ;;  %v251_v56 = vpop.f32.mrf.mxu1 }
 0x119   :  { %1715 = vmatprep.subr.mxu0 %v872_v60  ;;  %v1014_v61 = vpop.permute.xlu1 %1013  ;;  %1783 = vmatprep.mubr.f32.mxu1 %v1297_v59 }
 0x11a   :  { %1716 = vmatpush3.msra.mxu0 %v872_v60  ;;  %1753 = vmatprep.subr.mxu1 %v1014_v61  ;;  %v1560_v58 = vpop.f32.mrf.mxu1 }
 0x11b   :  { %1754 = vmatpush3.msra.mxu1 %v1014_v61 }
 0x11c   :  { %v870_v62 = vpop.permute.xlu0 %869  ;;  %v261_v59 = vpop.f32.mrf.mxu1 }
 0x11d   :  { %1717 = vmatprep.subr.mxu0 %v870_v62  ;;  %v1012_v63 = vpop.permute.xlu1 %1011 }
 0x11e   :  { %1718 = vmatpush3.msra.mxu0 %v870_v62  ;;  %1755 = vmatprep.subr.mxu1 %v1012_v63 }
 0x11f   :  { %1756 = vmatpush3.msra.mxu1 %v1012_v63 }
 0x120   :  { %v868_v12 = vpop.permute.xlu0 %867 }
 0x121   :  { %1719 = vmatprep.subr.mxu0 %v868_v12  ;;  %v1010_v13 = vpop.permute.xlu1 %1009 }
 0x122   :  { %1720 = vmatpush3.msra.mxu0 %v868_v12  ;;  %1757 = vmatprep.subr.mxu1 %v1010_v13 }
 0x123   :  { %1758 = vmatpush3.msra.mxu1 %v1010_v13 }
 0x124   :  { %v866_v18 = vpop.permute.xlu0 %865 }
 0x125   :  { %1721 = vmatprep.subr.mxu0 %v866_v18  ;;  %v1008_v19 = vpop.permute.xlu1 %1007 }
 0x126   :  { %1722 = vmatpush3.msra.mxu0 %v866_v18  ;;  %1759 = vmatprep.subr.mxu1 %v1008_v19 }
 0x127   :  { %1760 = vmatpush3.msra.mxu1 %v1008_v19 }
 0x128   :  { %v864_v20 = vpop.permute.xlu0 %863 }
 0x129   :  { %1723 = vmatprep.subr.mxu0 %v864_v20  ;;  %v1006_v21 = vpop.permute.xlu1 %1005 }
 0x12a   :  { %1724 = vmatpush3.msra.mxu0 %v864_v20  ;;  %1761 = vmatprep.subr.mxu1 %v1006_v21 }
 0x12b   :  { %1762 = vmatpush3.msra.mxu1 %v1006_v21 }
 0x12c   :  { %v862_v22 = vpop.permute.xlu0 %861 }
 0x12d   :  { %1725 = vmatprep.subr.mxu0 %v862_v22  ;;  %v1004_v23 = vpop.permute.xlu1 %1003 }
 0x12e   :  { %1726 = vmatpush3.msra.mxu0 %v862_v22  ;;  %1763 = vmatprep.subr.mxu1 %v1004_v23 }
 0x12f   :  { %1764 = vmatpush3.msra.mxu1 %v1004_v23 }
 0x130   :  { %v860_v24 = vpop.permute.xlu0 %859 }
 0x131   :  { %1727 = vmatprep.subr.mxu0 %v860_v24  ;;  %v1002_v25 = vpop.permute.xlu1 %1001 }
 0x132   :  { %1728 = vmatpush3.msra.mxu0 %v860_v24  ;;  %1765 = vmatprep.subr.mxu1 %v1002_v25 }
 0x133   :  { %1766 = vmatpush3.msra.mxu1 %v1002_v25 }
 0x134   :  { %v858_v26 = vpop.permute.xlu0 %857 }
 0x135   :  { %1729 = vmatprep.subr.mxu0 %v858_v26  ;;  %v1000_v27 = vpop.permute.xlu1 %999 }
 0x136   :  { %1730 = vmatpush3.msra.mxu0 %v858_v26  ;;  %1767 = vmatprep.subr.mxu1 %v1000_v27 }
 0x137   :  { %1768 = vmatpush3.msra.mxu1 %v1000_v27 }
 0x138   :  { %v856_v28 = vpop.permute.xlu0 %855 }
 0x139   :  { %1731 = vmatprep.subr.mxu0 %v856_v28  ;;  %v998_v29 = vpop.permute.xlu1 %997 }
 0x13a   :  { %1732 = vmatpush3.msra.mxu0 %v856_v28  ;;  %1769 = vmatprep.subr.mxu1 %v998_v29 }
 0x13b   :  { %1770 = vmatpush3.msra.mxu1 %v998_v29 }
 0x13c   :  { %v854_v30 = vpop.permute.xlu0 %853 }
 0x13d   :  { %1733 = vmatprep.subr.mxu0 %v854_v30  ;;  %v996_v31 = vpop.permute.xlu1 %995 }
 0x13e   :  { %1734 = vmatpush3.msra.mxu0 %v854_v30  ;;  %1771 = vmatprep.subr.mxu1 %v996_v31 }
 0x13f   :  { %1772 = vmatpush3.msra.mxu1 %v996_v31 }
 0x140   :  { %v852_v32 = vpop.permute.xlu0 %851 }
 0x141   :  { %1735 = vmatprep.subr.mxu0 %v852_v32  ;;  %v994_v33 = vpop.permute.xlu1 %993 }
 0x142   :  { %1736 = vmatpush3.msra.mxu0 %v852_v32  ;;  %1773 = vmatprep.subr.mxu1 %v994_v33 }
 0x143   :  { %1774 = vmatpush3.msra.mxu1 %v994_v33 }
 0x144   :  { %v850_v34 = vpop.permute.xlu0 %849 }
 0x145   :  { %1737 = vmatprep.subr.mxu0 %v850_v34  ;;  %v992_v35 = vpop.permute.xlu1 %991 }
 0x146   :  { %1738 = vmatpush3.msra.mxu0 %v850_v34  ;;  %1775 = vmatprep.subr.mxu1 %v992_v35 }
 0x147   :  { %1776 = vmatpush3.msra.mxu1 %v992_v35 }
 0x148   :  { %v848_v36 = vpop.permute.xlu0 %847 }
 0x149   :  { %1739 = vmatprep.subr.mxu0 %v848_v36  ;;  %v990_v37 = vpop.permute.xlu1 %989 }
 0x14a   :  { %1740 = vmatpush3.msra.mxu0 %v848_v36  ;;  %1777 = vmatprep.subr.mxu1 %v990_v37 }
 0x14b   :  { %1778 = vmatpush3.msra.mxu1 %v990_v37 }
 0x14c   :  { %v846_v38 = vpop.permute.xlu0 %845 }
 0x14d   :  { %1741 = vmatprep.subr.mxu0 %v846_v38  ;;  %v988_v39 = vpop.permute.xlu1 %987 }
 0x14e   :  { %1742 = vmatpush3.msra.mxu0 %v846_v38  ;;  %1779 = vmatprep.subr.mxu1 %v988_v39 }
 0x14f   :  { %1780 = vmatpush3.msra.mxu1 %v988_v39 }
 0x150   :  { %v844_v40 = vpop.permute.xlu0 %843 }
 0x151   :  { %1743 = vmatprep.subr.mxu0 %v844_v40  ;;  %v986_v42 = vpop.permute.xlu1 %985 }
 0x152   :  { %1744 = vmatpush3.msra.mxu0 %v844_v40  ;;  %1781 = vmatprep.subr.mxu1 %v986_v42 }
 0x153   :  { %1746 = vmatmul.mubr.f32.vlgmr.msra.gmra.mxu0 %v1294_v41  ;;  %1782 = vmatpush3.msra.mxu1 %v986_v42 }
 0x154   :  { %v1158_v0 = vpop.permute.xlu0 %1157  ;;  %1784 = vmatmul.mubr.f32.vlgmr.msra.gmra.mxu1 %v1298_v43  ;;  %1748 = vmatprep.mubr.f32.mxu0 %v1295_v44 }
 0x155   :  { %1789 = vmatprep.subr.mxu0 %v1158_v0  ;;  %1827 = vmatprep.subr.mxu1 %v1158_v0  ;;  %v1156_v1 = vpop.permute.xlu1 %1155 }
 0x156   :  { %1790 = vmatpush3.msra.mxu0 %v1158_v0  ;;  %1843 = vmatpush3.msra.mxu1 %v1158_v0 }
 0x157   :  { %1749 = vmatmul.mubr.f32.gmra.mxu0 %v1296_v2  ;;  %1791 = vmatprep.subr.mxu0 %v1156_v1 }
 0x158   :  { %1828 = vmatprep.subr.mxu1 %v1156_v1  ;;  %v1154_v5 = vpop.permute.xlu0 %1153  ;;  %1786 = vmatprep.mubr.f32.mxu1 %v1299_v3  ;;  %v1519_v52 = vpop.f32.mrf.mxu0 }
 0x159   :  { %1792 = vmatpush3.msra.mxu0 %v1156_v1  ;;  %1844 = vmatpush3.msra.mxu1 %v1156_v1  ;;  %v1152_v6 = vpop.permute.xlu1 %1151  ;;  %v257_v26 = vadd.f32 %v1557_v54, %v1519_v52 }
 0x15a   :  { %1787 = vmatmul.mubr.f32.gmra.mxu1 %v1300_v4  ;;  %1793 = vmatprep.subr.mxu0 %v1154_v5  ;;  %v166_v53 = vpop.f32.mrf.mxu0 }
 0x15b   :  { %1829 = vmatprep.subr.mxu1 %v1154_v5  ;;  %1794 = vmatpush3.msra.mxu0 %v1154_v5  ;;  %v252_v28 = vadd.f32 %v251_v56, %v166_v53 }
 0x15c   :  { %1845 = vmatpush3.msra.mxu1 %v1154_v5  ;;  %1795 = vmatprep.subr.mxu0 %v1152_v6  ;;  %v1150_v7 = vpop.permute.xlu0 %1149 }
 0x15d   :  { %1830 = vmatprep.subr.mxu1 %v1152_v6  ;;  %1796 = vmatpush3.msra.mxu0 %v1152_v6  ;;  %v1148_v8 = vpop.permute.xlu1 %1147 }
 0x15e   :  { %1846 = vmatpush3.msra.mxu1 %v1152_v6  ;;  %1797 = vmatprep.subr.mxu0 %v1150_v7 }
 0x15f   :  { %1831 = vmatprep.subr.mxu1 %v1150_v7  ;;  %1798 = vmatpush3.msra.mxu0 %v1150_v7 }
 0x160   :  { %1847 = vmatpush3.msra.mxu1 %v1150_v7  ;;  %1799 = vmatprep.subr.mxu0 %v1148_v8  ;;  %v1146_v9 = vpop.permute.xlu0 %1145  ;;  %v1522_v55 = vpop.f32.mrf.mxu0 }
 0x161   :  { %1832 = vmatprep.subr.mxu1 %v1148_v8  ;;  %1800 = vmatpush3.msra.mxu0 %v1148_v8  ;;  %v1144_v10 = vpop.permute.xlu1 %1143  ;;  %v267_v25 = vadd.f32 %v1560_v58, %v1522_v55 }
 0x162   :  { %1848 = vmatpush3.msra.mxu1 %v1148_v8  ;;  %1801 = vmatprep.subr.mxu0 %v1146_v9  ;;  %v176_v57 = vpop.f32.mrf.mxu0 }
 0x163   :  { %1833 = vmatprep.subr.mxu1 %v1146_v9  ;;  %1802 = vmatpush3.msra.mxu0 %v1146_v9  ;;  %v262_v27 = vadd.f32 %v261_v59, %v176_v57 }
 0x164   :  { %1849 = vmatpush3.msra.mxu1 %v1146_v9  ;;  %1803 = vmatprep.subr.mxu0 %v1144_v10  ;;  %v1142_v11 = vpop.permute.xlu0 %1141 }
 0x165   :  { %1834 = vmatprep.subr.mxu1 %v1144_v10  ;;  %1804 = vmatpush3.msra.mxu0 %v1144_v10  ;;  %v1140_v14 = vpop.permute.xlu1 %1139 }
 0x166   :  { %1850 = vmatpush3.msra.mxu1 %v1144_v10  ;;  %1805 = vmatprep.subr.mxu0 %v1142_v11 }
 0x167   :  { %1835 = vmatprep.subr.mxu1 %v1142_v11  ;;  %1806 = vmatpush3.msra.mxu0 %v1142_v11 }
 0x168   :  { %1851 = vmatpush3.msra.mxu1 %v1142_v11  ;;  %1807 = vmatprep.subr.mxu0 %v1140_v14  ;;  %v1138_v15 = vpop.permute.xlu0 %1137 }
 0x169   :  { %1836 = vmatprep.subr.mxu1 %v1140_v14  ;;  %1808 = vmatpush3.msra.mxu0 %v1140_v14  ;;  %v1136_v45 = vpop.permute.xlu1 %1135 }
 0x16a   :  { %1852 = vmatpush3.msra.mxu1 %v1140_v14  ;;  %1809 = vmatprep.subr.mxu0 %v1138_v15 }
 0x16b   :  { %1837 = vmatprep.subr.mxu1 %v1138_v15  ;;  %1810 = vmatpush3.msra.mxu0 %v1138_v15 }
 0x16c   :  { %1853 = vmatpush3.msra.mxu1 %v1138_v15  ;;  %1811 = vmatprep.subr.mxu0 %v1136_v45  ;;  %v1134_v46 = vpop.permute.xlu0 %1133 }
 0x16d   :  { %1838 = vmatprep.subr.mxu1 %v1136_v45  ;;  %1812 = vmatpush3.msra.mxu0 %v1136_v45  ;;  %v1132_v16 = vpop.permute.xlu1 %1131 }
 0x16e   :  { %1854 = vmatpush3.msra.mxu1 %v1136_v45  ;;  %1813 = vmatprep.subr.mxu0 %v1134_v46 }
 0x16f   :  { %1839 = vmatprep.subr.mxu1 %v1134_v46  ;;  %1814 = vmatpush3.msra.mxu0 %v1134_v46 }
 0x170   :  { %1855 = vmatpush3.msra.mxu1 %v1134_v46  ;;  %1815 = vmatprep.subr.mxu0 %v1132_v16  ;;  %v1130_v17 = vpop.permute.xlu0 %1129 }
 0x171   :  { %1840 = vmatprep.subr.mxu1 %v1132_v16  ;;  %1816 = vmatpush3.msra.mxu0 %v1132_v16  ;;  %v1128_v47 = vpop.permute.xlu1 %1127 }
 0x172   :  { %1856 = vmatpush3.msra.mxu1 %v1132_v16  ;;  %1817 = vmatprep.subr.mxu0 %v1130_v17 }
 0x173   :  { %1841 = vmatprep.subr.mxu1 %v1130_v17  ;;  %1818 = vmatpush3.msra.mxu0 %v1130_v17 }
 0x174   :  { %1857 = vmatpush3.msra.mxu1 %v1130_v17  ;;  %1819 = vmatprep.subr.mxu0 %v1128_v47 }
 0x175   :  { %1842 = vmatprep.subr.mxu1 %v1128_v47  ;;  %1820 = vmatpush3.msra.mxu0 %v1128_v47 }
 0x176   :  { %1858 = vmatpush3.msra.mxu1 %v1128_v47  ;;  %1821 = vmatprep.mubr.f32.mxu0 %v1301_v48 }
 0x177   :  { %1824 = vmatprep.mubr.f32.mxu1 %v1303_v49  ;;  %1822 = vmatmul.mubr.f32.vlgmr.msra.gmra.mxu0 %v1302_v50 }
 0x178   :  { %1825 = vmatmul.mubr.f32.vlgmr.msra.gmra.mxu1 %v1304_v51 }
 0x194   :  { %v1595_v60 = vpop.f32.mrf.mxu0  ;;  %v1633_v62 = vpop.f32.mrf.mxu1 }
 0x195   :  { %v409_v32 = vadd.f32 %v1595_v60, %v257_v26 }
 0x196   :  { %v389_v61 = vpop.f32.mrf.mxu0  ;;  %v531_v12 = vpop.f32.mrf.mxu1 }
 0x197   :  { %v408_v35 = vadd.f32 %v389_v61, %v252_v28  ;;  %v551_v38 = vadd.f32 %v1633_v62, %v409_v32 }
 0x199   :  { %v550_v42 = vadd.f32 %v531_v12, %v408_v35 }
 0x19c   :  { %v1598_v63 = vpop.f32.mrf.mxu0  ;;  %v1636_v18 = vpop.f32.mrf.mxu1 }
 0x19d   :  { %v411_v31 = vadd.f32 %v1598_v63, %v267_v25 }
 0x19e   :  { %v399_v13 = vpop.f32.mrf.mxu0  ;;  %v541_v19 = vpop.f32.mrf.mxu1 }
 0x19f   :  { %v410_v34 = vadd.f32 %v399_v13, %v262_v27  ;;  %v553_v37 = vadd.f32 %v1636_v18, %v411_v31 }
 0x1a1   :  { %v552_v41 = vadd.f32 %v541_v19, %v410_v34 }
 0x1d3   :  { %v1671_v20 = vpop.f32.mrf.mxu0 }
 0x1d4   :  { %v1709_v22 = vpop.f32.mrf.mxu1  ;;  %v693_v43 = vadd.f32 %v1671_v20, %v551_v38 }
 0x1d5   :  { %v673_v21 = vpop.f32.mrf.mxu0 }
 0x1d6   :  { %v815_v24 = vpop.f32.mrf.mxu1  ;;  %v692_v0 = vadd.f32 %v673_v21, %v550_v42  ;;  %v835_v4 = vadd.f32 %v1709_v22, %v693_v43 }
 0x1d7   :  { %v1674_v23 = vpop.f32.mrf.mxu0 }
 0x1d8   :  { %v1712_v30 = vpop.f32.mrf.mxu1  ;;  %v695_v44 = vadd.f32 %v1674_v23, %v553_v37  ;;  %v834_v6 = vadd.f32 %v815_v24, %v692_v0 }
 0x1d9   :  { %v683_v29 = vpop.f32.mrf.mxu0 }
 0x1da   :  { %v825_v36 = vpop.f32.mrf.mxu1  ;;  %v694_v3 = vadd.f32 %v683_v29, %v552_v41  ;;  %v837_v5 = vadd.f32 %v1712_v30, %v695_v44 }
 0x1dc   :  { %v836_v10 = vadd.f32 %v825_v36, %v694_v3 }
 0x213   :  { %v1747_v33 = vpop.f32.mrf.mxu0 }
 0x214   :  { %v1785_v39 = vpop.f32.mrf.mxu1  ;;  %v977_v7 = vadd.f32 %v1747_v33, %v835_v4 }
 0x215   :  { %v957_v40 = vpop.f32.mrf.mxu0 }
 0x216   :  { %v1099_v2 = vpop.f32.mrf.mxu1  ;;  %v976_v14 = vadd.f32 %v957_v40, %v834_v6  ;;  %v1119_v45 = vadd.f32 %v1785_v39, %v977_v7 }
 0x217   :  { %v1750_v1 = vpop.f32.mrf.mxu0 }
 0x218   :  { %v979_v11 = vadd.f32 %v1750_v1, %v837_v5  ;;  %v1118_v47 = vadd.f32 %v1099_v2, %v976_v14 }
 0x219   :  { %v967_v8 = vpop.f32.mrf.mxu0 }
 0x21a   :  { %v1788_v9 = vpop.f32.mrf.mxu1  ;;  %v978_v15 = vadd.f32 %v967_v8, %v836_v10 }
 0x21b   :  { %v1121_v16 = vadd.f32 %v1788_v9, %v979_v11 }
 0x21c   :  { %v1109_v46 = vpop.f32.mrf.mxu1 }
 0x21d   :  { %v1120_v50 = vadd.f32 %v1109_v46, %v978_v15 }
 0x237   :  { %v1823_v17 = vpop.f32.mrf.mxu0 }
 0x238   :  { %v1261_v48 = vadd.f32 %v1823_v17, %v1119_v45  ;;  %v1826_v49 = vpop.f32.mrf.mxu1 }
 0x239   :  { %v1263_v51 = vadd.f32 %v1826_v49, %v1121_v16  ;;  %v1241_v52 = vpop.f32.mrf.mxu0 }
 0x23a   :  { %1266 = vst.msk [vmem:[%s2380_s2 + $0x8] sm:$0xff] %vm1264_vm0, %v1261_v48  ;;  %v1260_v53 = vadd.f32 %v1241_v52, %v1118_v47  ;;  %v1251_v54 = vpop.f32.mrf.mxu1 }
 0x23b   :  { %1268 = vst.msk [vmem:[%s2380_s2 + $0x18] sm:$0xff] %vm1264_vm0, %v1263_v51  ;;  %v1262_v55 = vadd.f32 %v1251_v54, %v1120_v50 }
 0x23c   :  { %1265 = vst.msk [vmem:[%s2380_s2] sm:$0xff] %vm1264_vm0, %v1260_v53 }
 0x23d   :  { %1267 = vst.msk [vmem:[%s2380_s2 + $0x10] sm:$0xff] %vm1264_vm0, %v1262_v55 }

</bundles_post_ra>
